<compile_context>
chip_gen: v6e
topology: v6e:2x2x1
jax: 0.10.0
libtpu: 0.0.40
codegen_flags: <defaults>
</compile_context>

<pallas_src>
import jax
import jax.numpy as jnp
from jax import lax
from jax.experimental import pallas as pl
from jax.experimental.pallas import tpu as pltpu

EPS = 1e-5  # PyTorch LayerNorm default


def _make_kernel(mxu_dtype, approx_recip, return_attn):
    def kernel(t_ref, w1_ref, b1_ref, w2_ref, b2_ref,
               g1_ref, be1_ref, g2_ref, be2_ref, *out_refs):
        out_ref = out_refs[0]

        def layernorm(v, gamma, beta):
            # fused single-pass reduction: var = E[v^2] - mu^2
            mu = jnp.mean(v, axis=-1, keepdims=True)
            ms = jnp.mean(v * v, axis=-1, keepdims=True)
            var = ms - mu * mu
            return (v - mu) * lax.rsqrt(var + EPS) * gamma + beta

        t = t_ref[0]                                   # [L, D] f32
        tm = t.astype(mxu_dtype)

        # ---- self-attention: softmax(t t^T / sqrt(D)) @ t ----
        # contraction expressed directly on the feature axis (no .T transpose)
        scale = 1.0 / jnp.sqrt(jnp.float32(t.shape[-1]))
        scores = lax.dot_general(
            tm, tm, (((1,), (1,)), ((), ())),
            preferred_element_type=jnp.float32) * scale
        scores = scores - jnp.max(scores, axis=-1, keepdims=True)
        e = jnp.exp(scores)
        denom = jnp.sum(e, axis=-1, keepdims=True)
        probs = e * pl.reciprocal(denom, approx=approx_recip)
        new_t = jnp.dot(probs.astype(mxu_dtype), tm,
                        preferred_element_type=jnp.float32)
        # TODO(synk): dropout is identity (eval mode); training-mode dropout not implemented.

        # ---- norm1 -> conv1(1x1) -> relu -> conv2(1x1) -> residual -> norm2 ----
        t1 = layernorm(new_t, g1_ref[0], be1_ref[0])
        h = jnp.dot(t1.astype(mxu_dtype), w1_ref[...],
                    preferred_element_type=jnp.float32) + b1_ref[0]
        h = jnp.maximum(h, 0.0)
        y = jnp.dot(h.astype(mxu_dtype), w2_ref[...],
                    preferred_element_type=jnp.float32) + b2_ref[0]
        out_ref[0] = layernorm(t1 + y, g2_ref[0], be2_ref[0])

        if return_attn:
            out_refs[1][0] = probs

    return kernel


def encoder_layer(x, globalx, params, *,
                  mxu_dtype=jnp.float32, approx_recip=False, return_attn=True):
    """Returns (norm2(x+y), attn, norm2(gx+gy), global_series) like the module.

    mxu_dtype=jnp.bfloat16 casts matmul operands (f32 accumulation) — the
    recommended setting on v6e/v7x.  return_attn=False skips the O(L^2)
    attention-probability side outputs (HBM-writeback dominant at real L).
    """
    B, L, D = x.shape
    w1, b1, w2, b2, g1, be1, g2, be2 = params
    d_ff = w1.shape[1]

    # cast the matmul weights once here, not per grid step inside the kernel
    w1c = w1.astype(mxu_dtype)
    w2c = w2.astype(mxu_dtype)

    # fold the two streams into the grid: [2B, L, D]
    t_all = jnp.concatenate([x, globalx], axis=0)
    n = 2 * B

    act_spec = pl.BlockSpec((1, L, D), lambda i: (i, 0, 0))
    attn_spec = pl.BlockSpec((1, L, L), lambda i: (i, 0, 0))
    full = lambda shape: pl.BlockSpec(shape, lambda i: (0,) * len(shape))
    # TODO(synk): single-buffer the resident weights (pipeline_mode=pl.Buffered(1))
    # to drop the duplicate double-buffer VMEM copy at production D/d_ff.

    out_shapes = [jax.ShapeDtypeStruct((n, L, D), jnp.float32)]
    out_specs = [act_spec]
    if return_attn:
        out_shapes.append(jax.ShapeDtypeStruct((n, L, L), jnp.float32))
        out_specs.append(attn_spec)

    itemsize = jnp.dtype(mxu_dtype).itemsize
    cost = pl.CostEstimate(
        flops=n * (4 * L * L * D + 4 * L * D * d_ff),
        transcendentals=n * (L * L + 2 * L),
        bytes_accessed=(2 * n * L * D * 4
                        + 2 * D * d_ff * itemsize + (d_ff + 5 * D) * 4
                        + (n * L * L * 4 if return_attn else 0)),
    )

    outs = pl.pallas_call(
        _make_kernel(mxu_dtype, approx_recip, return_attn),
        out_shape=tuple(out_shapes),
        grid_spec=pltpu.PrefetchScalarGridSpec(
            num_scalar_prefetch=0,
            grid=(n,),
            in_specs=[
                act_spec,
                full((D, d_ff)), full((1, d_ff)),
                full((d_ff, D)), full((1, D)),
                full((1, D)), full((1, D)),
                full((1, D)), full((1, D)),
            ],
            out_specs=out_specs,
        ),
        compiler_params=pltpu.CompilerParams(
            dimension_semantics=("parallel",),
            vmem_limit_bytes=32 * 1024 * 1024,
        ),
        cost_estimate=cost,
    )(t_all, w1c, b1, w2c, b2, g1, be1, g2, be2)

    out_all = outs[0]
    out_x, out_g = out_all[:B], out_all[B:]
    if return_attn:
        attn_all = outs[1]
        return out_x, attn_all[:B], out_g, attn_all[B:]
    return out_x, None, out_g, None


def reference(x, globalx, params, *, mxu_dtype=jnp.float32):
    w1, b1, w2, b2, g1, be1, g2, be2 = params
    w1 = w1.astype(mxu_dtype)
    w2 = w2.astype(mxu_dtype)

    def ln(v, g, b):
        mu = jnp.mean(v, -1, keepdims=True)
        var = jnp.mean((v - mu) ** 2, -1, keepdims=True)
        return (v - mu) / jnp.sqrt(var + EPS) * g + b

    def branch(t):
        tm = t.astype(mxu_dtype)
        scale = 1.0 / jnp.sqrt(jnp.float32(t.shape[-1]))
        s = jnp.einsum("bld,bmd->blm", tm, tm,
                       preferred_element_type=jnp.float32) * scale
        p = jax.nn.softmax(s, axis=-1)
        new_t = jnp.einsum("blm,bmd->bld", p.astype(mxu_dtype), tm,
                           preferred_element_type=jnp.float32)
        t1 = ln(new_t, g1[0], be1[0])
        h = jax.nn.relu(jnp.dot(t1.astype(mxu_dtype), w1,
                                preferred_element_type=jnp.float32) + b1[0])
        y = jnp.dot(h.astype(mxu_dtype), w2,
                    preferred_element_type=jnp.float32) + b2[0]
        return ln(t1 + y, g2[0], be2[0]), p

    ox, a = branch(x)
    og, ga = branch(globalx)
    return ox, a, og, ga


if __name__ == "__main__":
    B, L, D = 2, 8, 32
    d_ff = 4 * D

    key = jax.random.PRNGKey(0)
    ks = jax.random.split(key, 6)
    x = jax.random.normal(ks[0], (B, L, D), jnp.float32)
    globalx = jax.random.normal(ks[1], (B, L, D), jnp.float32)

    # conv1: [d_ff, d_model, 1] -> W1 [D, d_ff]; conv2: [d_model, d_ff, 1] -> W2 [d_ff, D]
    w1 = jax.random.normal(ks[2], (D, d_ff), jnp.float32) * 0.05
    b1 = jax.random.normal(ks[3], (1, d_ff), jnp.float32) * 0.05
    w2 = jax.random.normal(ks[4], (d_ff, D), jnp.float32) * 0.05
    b2 = jax.random.normal(ks[5], (1, D), jnp.float32) * 0.05
    g1 = jnp.ones((1, D), jnp.float32)
    be1 = jnp.zeros((1, D), jnp.float32)
    g2 = jnp.ones((1, D), jnp.float32)
    be2 = jnp.zeros((1, D), jnp.float32)
    params = (w1, b1, w2, b2, g1, be1, g2, be2)

    # 1) exact path (f32 MXU operands, exact reciprocal): tight check vs f32 reference
    outs = jax.block_until_ready(encoder_layer(x, globalx, params))
    refs = reference(x, globalx, params)
    for o, r in zip(outs, refs):
        assert o.shape == r.shape
        err = jnp.max(jnp.abs(o - r))
        assert err < 1e-4, err

    # 2) fast path (bf16 MXU operands + approx EUP reciprocal), the v6e/v7x setting;
    #    validated against a bf16-operand reference.
    outs_fast = jax.block_until_ready(
        encoder_layer(x, globalx, params,
                      mxu_dtype=jnp.bfloat16, approx_recip=True))
    refs_bf16 = reference(x, globalx, params, mxu_dtype=jnp.bfloat16)
    for o, r in zip(outs_fast, refs_bf16):
        assert o.shape == r.shape
        err = jnp.max(jnp.abs(o - r))
        assert err < 5e-3, err

    print("KERNEL_OK")
</pallas_src>

<mosaic_0001>
module attributes {stable_mosaic.version = 11 : i64} {
  func.func @kernel(%arg0: i32, %arg1: memref<1x8x32xf32, #tpu.memory_space<vmem>>, %arg2: memref<32x128xf32, #tpu.memory_space<vmem>>, %arg3: memref<1x128xf32, #tpu.memory_space<vmem>>, %arg4: memref<128x32xf32, #tpu.memory_space<vmem>>, %arg5: memref<1x32xf32, #tpu.memory_space<vmem>>, %arg6: memref<1x32xf32, #tpu.memory_space<vmem>>, %arg7: memref<1x32xf32, #tpu.memory_space<vmem>>, %arg8: memref<1x32xf32, #tpu.memory_space<vmem>>, %arg9: memref<1x32xf32, #tpu.memory_space<vmem>>, %arg10: memref<1x8x32xf32, #tpu.memory_space<vmem>>, %arg11: memref<1x8x8xf32, #tpu.memory_space<vmem>>) attributes {dimension_semantics = [#tpu.dimension_semantics<parallel>], iteration_bounds = array<i64: 4>, scalar_prefetch = 0 : i64, scratch_operands = 0 : i64, tpu.core_type = #tpu.core_type<tc>, window_params = [{transform_indices = @transform_0, window_bounds = array<i64: 1, 8, 32>}, {pipeline_mode = #tpu.pipeline_mode<synchronous>, transform_indices = @transform_1, window_bounds = array<i64: 32, 128>}, {pipeline_mode = #tpu.pipeline_mode<synchronous>, transform_indices = @transform_2, window_bounds = array<i64: 1, 128>}, {pipeline_mode = #tpu.pipeline_mode<synchronous>, transform_indices = @transform_3, window_bounds = array<i64: 128, 32>}, {pipeline_mode = #tpu.pipeline_mode<synchronous>, transform_indices = @transform_4, window_bounds = array<i64: 1, 32>}, {pipeline_mode = #tpu.pipeline_mode<synchronous>, transform_indices = @transform_5, window_bounds = array<i64: 1, 32>}, {pipeline_mode = #tpu.pipeline_mode<synchronous>, transform_indices = @transform_6, window_bounds = array<i64: 1, 32>}, {pipeline_mode = #tpu.pipeline_mode<synchronous>, transform_indices = @transform_7, window_bounds = array<i64: 1, 32>}, {pipeline_mode = #tpu.pipeline_mode<synchronous>, transform_indices = @transform_8, window_bounds = array<i64: 1, 32>}, {transform_indices = @transform_9, window_bounds = array<i64: 1, 8, 32>}, {transform_indices = @transform_10, window_bounds = array<i64: 1, 8, 8>}]} {
    %c0 = arith.constant 0 : index
    %c0_0 = arith.constant 0 : index
    %c0_1 = arith.constant 0 : index
    %0 = vector.load %arg1[%c0, %c0_0, %c0_1] : memref<1x8x32xf32, #tpu.memory_space<vmem>>, vector<1x8x32xf32>
    %1 = vector.shape_cast %0 : vector<1x8x32xf32> to vector<8x32xf32>
    %cst = arith.constant 3.200000e+01 : f32
    %2 = math.sqrt %cst : f32
    %cst_2 = arith.constant 1.000000e+00 : f32
    %3 = arith.divf %cst_2, %2 : f32
    %cst_3 = arith.constant dense<0.000000e+00> : vector<8x8xf32>
    %4 = tpu.matmul %1, %1, %cst_3 {dimension_numbers = #tpu.dot_dimension_numbers<[1], [1], [0], [0], [0, 0, 1, 0], [], []>} : vector<8x32xf32>, vector<8x32xf32>, vector<8x8xf32> -> vector<8x8xf32>
    %5 = vector.broadcast %3 : f32 to vector<8x8xf32>
    %6 = arith.mulf %4, %5 : vector<8x8xf32>
    %cst_4 = arith.constant dense<0xFF800000> : vector<8xf32>
    %7 = vector.multi_reduction <maximumf>, %6, %cst_4 [1] : vector<8x8xf32> to vector<8xf32>
    %8 = vector.shape_cast %7 : vector<8xf32> to vector<8x1xf32>
    %9 = vector.broadcast %8 : vector<8x1xf32> to vector<8x8xf32>
    %10 = arith.subf %6, %9 : vector<8x8xf32>
    %11 = math.exp %10 : vector<8x8xf32>
    %cst_5 = arith.constant dense<0.000000e+00> : vector<8xf32>
    %12 = vector.multi_reduction <add>, %11, %cst_5 [1] : vector<8x8xf32> to vector<8xf32>
    %13 = vector.shape_cast %12 : vector<8xf32> to vector<8x1xf32>
    %14 = tpu.reciprocal %13 : vector<8x1xf32> -> vector<8x1xf32>
    %15 = vector.broadcast %14 : vector<8x1xf32> to vector<8x8xf32>
    %16 = arith.mulf %11, %15 : vector<8x8xf32>
    %cst_6 = arith.constant dense<0.000000e+00> : vector<8x32xf32>
    %17 = tpu.matmul %16, %1, %cst_6 {dimension_numbers = #tpu.dot_dimension_numbers<[1], [0], [0], [1], [0, 0, 1, 1], [], []>} : vector<8x8xf32>, vector<8x32xf32>, vector<8x32xf32> -> vector<8x32xf32>
    %c0_7 = arith.constant 0 : index
    %c0_8 = arith.constant 0 : index
    %18 = vector.load %arg6[%c0_7, %c0_8] : memref<1x32xf32, #tpu.memory_space<vmem>>, vector<1x32xf32>
    %19 = vector.shape_cast %18 : vector<1x32xf32> to vector<32xf32>
    %c0_9 = arith.constant 0 : index
    %c0_10 = arith.constant 0 : index
    %20 = vector.load %arg7[%c0_9, %c0_10] : memref<1x32xf32, #tpu.memory_space<vmem>>, vector<1x32xf32>
    %21 = vector.shape_cast %20 : vector<1x32xf32> to vector<32xf32>
    %cst_11 = arith.constant dense<0.000000e+00> : vector<8xf32>
    %22 = vector.multi_reduction <add>, %17, %cst_11 [1] : vector<8x32xf32> to vector<8xf32>
    %23 = vector.shape_cast %22 : vector<8xf32> to vector<8x1xf32>
    %cst_12 = arith.constant 3.200000e+01 : f32
    %24 = vector.broadcast %cst_12 : f32 to vector<8x1xf32>
    %25 = arith.divf %23, %24 : vector<8x1xf32>
    %26 = arith.mulf %17, %17 : vector<8x32xf32>
    %cst_13 = arith.constant dense<0.000000e+00> : vector<8xf32>
    %27 = vector.multi_reduction <add>, %26, %cst_13 [1] : vector<8x32xf32> to vector<8xf32>
    %28 = vector.shape_cast %27 : vector<8xf32> to vector<8x1xf32>
    %cst_14 = arith.constant 3.200000e+01 : f32
    %29 = vector.broadcast %cst_14 : f32 to vector<8x1xf32>
    %30 = arith.divf %28, %29 : vector<8x1xf32>
    %31 = arith.mulf %25, %25 : vector<8x1xf32>
    %32 = arith.subf %30, %31 : vector<8x1xf32>
    %33 = vector.broadcast %25 : vector<8x1xf32> to vector<8x32xf32>
    %34 = arith.subf %17, %33 : vector<8x32xf32>
    %cst_15 = arith.constant 9.99999974E-6 : f32
    %35 = vector.broadcast %cst_15 : f32 to vector<8x1xf32>
    %36 = arith.addf %32, %35 : vector<8x1xf32>
    %37 = math.rsqrt %36 : vector<8x1xf32>
    %38 = vector.broadcast %37 : vector<8x1xf32> to vector<8x32xf32>
    %39 = arith.mulf %34, %38 : vector<8x32xf32>
    %40 = vector.shape_cast %19 : vector<32xf32> to vector<1x32xf32>
    %41 = vector.broadcast %40 : vector<1x32xf32> to vector<8x32xf32>
    %42 = arith.mulf %39, %41 : vector<8x32xf32>
    %43 = vector.shape_cast %21 : vector<32xf32> to vector<1x32xf32>
    %44 = vector.broadcast %43 : vector<1x32xf32> to vector<8x32xf32>
    %45 = arith.addf %42, %44 : vector<8x32xf32>
    %c0_16 = arith.constant 0 : index
    %c0_17 = arith.constant 0 : index
    %46 = vector.load %arg2[%c0_16, %c0_17] : memref<32x128xf32, #tpu.memory_space<vmem>>, vector<32x128xf32>
    %cst_18 = arith.constant dense<0.000000e+00> : vector<8x128xf32>
    %47 = tpu.matmul %45, %46, %cst_18 {dimension_numbers = #tpu.dot_dimension_numbers<[1], [0], [0], [1], [0, 0, 1, 1], [], []>} : vector<8x32xf32>, vector<32x128xf32>, vector<8x128xf32> -> vector<8x128xf32>
    %c0_19 = arith.constant 0 : index
    %c0_20 = arith.constant 0 : index
    %48 = vector.load %arg3[%c0_19, %c0_20] : memref<1x128xf32, #tpu.memory_space<vmem>>, vector<1x128xf32>
    %49 = vector.shape_cast %48 : vector<1x128xf32> to vector<128xf32>
    %50 = vector.shape_cast %49 : vector<128xf32> to vector<1x128xf32>
    %51 = vector.broadcast %50 : vector<1x128xf32> to vector<8x128xf32>
    %52 = arith.addf %47, %51 : vector<8x128xf32>
    %cst_21 = arith.constant 0.000000e+00 : f32
    %53 = vector.broadcast %cst_21 : f32 to vector<8x128xf32>
    %54 = arith.maximumf %52, %53 : vector<8x128xf32>
    %c0_22 = arith.constant 0 : index
    %c0_23 = arith.constant 0 : index
    %55 = vector.load %arg4[%c0_22, %c0_23] : memref<128x32xf32, #tpu.memory_space<vmem>>, vector<128x32xf32>
    %cst_24 = arith.constant dense<0.000000e+00> : vector<8x32xf32>
    %56 = tpu.matmul %54, %55, %cst_24 {dimension_numbers = #tpu.dot_dimension_numbers<[1], [0], [0], [1], [0, 0, 1, 1], [], []>} : vector<8x128xf32>, vector<128x32xf32>, vector<8x32xf32> -> vector<8x32xf32>
    %c0_25 = arith.constant 0 : index
    %c0_26 = arith.constant 0 : index
    %57 = vector.load %arg5[%c0_25, %c0_26] : memref<1x32xf32, #tpu.memory_space<vmem>>, vector<1x32xf32>
    %58 = vector.shape_cast %57 : vector<1x32xf32> to vector<32xf32>
    %59 = vector.shape_cast %58 : vector<32xf32> to vector<1x32xf32>
    %60 = vector.broadcast %59 : vector<1x32xf32> to vector<8x32xf32>
    %61 = arith.addf %56, %60 : vector<8x32xf32>
    %62 = arith.addf %45, %61 : vector<8x32xf32>
    %c0_27 = arith.constant 0 : index
    %c0_28 = arith.constant 0 : index
    %63 = vector.load %arg8[%c0_27, %c0_28] : memref<1x32xf32, #tpu.memory_space<vmem>>, vector<1x32xf32>
    %64 = vector.shape_cast %63 : vector<1x32xf32> to vector<32xf32>
    %c0_29 = arith.constant 0 : index
    %c0_30 = arith.constant 0 : index
    %65 = vector.load %arg9[%c0_29, %c0_30] : memref<1x32xf32, #tpu.memory_space<vmem>>, vector<1x32xf32>
    %66 = vector.shape_cast %65 : vector<1x32xf32> to vector<32xf32>
    %cst_31 = arith.constant dense<0.000000e+00> : vector<8xf32>
    %67 = vector.multi_reduction <add>, %62, %cst_31 [1] : vector<8x32xf32> to vector<8xf32>
    %68 = vector.shape_cast %67 : vector<8xf32> to vector<8x1xf32>
    %cst_32 = arith.constant 3.200000e+01 : f32
    %69 = vector.broadcast %cst_32 : f32 to vector<8x1xf32>
    %70 = arith.divf %68, %69 : vector<8x1xf32>
    %71 = arith.mulf %62, %62 : vector<8x32xf32>
    %cst_33 = arith.constant dense<0.000000e+00> : vector<8xf32>
    %72 = vector.multi_reduction <add>, %71, %cst_33 [1] : vector<8x32xf32> to vector<8xf32>
    %73 = vector.shape_cast %72 : vector<8xf32> to vector<8x1xf32>
    %cst_34 = arith.constant 3.200000e+01 : f32
    %74 = vector.broadcast %cst_34 : f32 to vector<8x1xf32>
    %75 = arith.divf %73, %74 : vector<8x1xf32>
    %76 = arith.mulf %70, %70 : vector<8x1xf32>
    %77 = arith.subf %75, %76 : vector<8x1xf32>
    %78 = vector.broadcast %70 : vector<8x1xf32> to vector<8x32xf32>
    %79 = arith.subf %62, %78 : vector<8x32xf32>
    %cst_35 = arith.constant 9.99999974E-6 : f32
    %80 = vector.broadcast %cst_35 : f32 to vector<8x1xf32>
    %81 = arith.addf %77, %80 : vector<8x1xf32>
    %82 = math.rsqrt %81 : vector<8x1xf32>
    %83 = vector.broadcast %82 : vector<8x1xf32> to vector<8x32xf32>
    %84 = arith.mulf %79, %83 : vector<8x32xf32>
    %85 = vector.shape_cast %64 : vector<32xf32> to vector<1x32xf32>
    %86 = vector.broadcast %85 : vector<1x32xf32> to vector<8x32xf32>
    %87 = arith.mulf %84, %86 : vector<8x32xf32>
    %88 = vector.shape_cast %66 : vector<32xf32> to vector<1x32xf32>
    %89 = vector.broadcast %88 : vector<1x32xf32> to vector<8x32xf32>
    %90 = arith.addf %87, %89 : vector<8x32xf32>
    %c0_36 = arith.constant 0 : index
    %c0_37 = arith.constant 0 : index
    %c0_38 = arith.constant 0 : index
    %91 = vector.load %arg10[%c0_36, %c0_37, %c0_38] : memref<1x8x32xf32, #tpu.memory_space<vmem>>, vector<1x8x32xf32>
    %92 = vector.shape_cast %91 : vector<1x8x32xf32> to vector<8x32xf32>
    %93 = vector.shape_cast %90 : vector<8x32xf32> to vector<1x8x32xf32>
    tpu.vector_store %arg10[%c0_36, %c0_37, %c0_38], %93 {strides = array<i32>} : memref<1x8x32xf32, #tpu.memory_space<vmem>>, vector<1x8x32xf32>,
    %c0_39 = arith.constant 0 : index
    %c0_40 = arith.constant 0 : index
    %c0_41 = arith.constant 0 : index
    %94 = vector.load %arg11[%c0_39, %c0_40, %c0_41] : memref<1x8x8xf32, #tpu.memory_space<vmem>>, vector<1x8x8xf32>
    %95 = vector.shape_cast %94 : vector<1x8x8xf32> to vector<8x8xf32>
    %96 = vector.shape_cast %16 : vector<8x8xf32> to vector<1x8x8xf32>
    tpu.vector_store %arg11[%c0_39, %c0_40, %c0_41], %96 {strides = array<i32>} : memref<1x8x8xf32, #tpu.memory_space<vmem>>, vector<1x8x8xf32>,
    return
  }
  func.func @transform_0(%arg0: i32) -> (i32, i32, i32) {
    %c0_i32 = arith.constant 0 : i32
    %c0_i32_0 = arith.constant 0 : i32
    %c0_i32_1 = arith.constant 0 : i32
    return %arg0, %c0_i32, %c0_i32_0 : i32, i32, i32
  }
  func.func @transform_1(%arg0: i32) -> (i32, i32) {
    %c0_i32 = arith.constant 0 : i32
    %c0_i32_0 = arith.constant 0 : i32
    %c0_i32_1 = arith.constant 0 : i32
    return %c0_i32, %c0_i32_0 : i32, i32
  }
  func.func @transform_2(%arg0: i32) -> (i32, i32) {
    %c0_i32 = arith.constant 0 : i32
    %c0_i32_0 = arith.constant 0 : i32
    %c0_i32_1 = arith.constant 0 : i32
    return %c0_i32, %c0_i32_0 : i32, i32
  }
  func.func @transform_3(%arg0: i32) -> (i32, i32) {
    %c0_i32 = arith.constant 0 : i32
    %c0_i32_0 = arith.constant 0 : i32
    %c0_i32_1 = arith.constant 0 : i32
    return %c0_i32, %c0_i32_0 : i32, i32
  }
  func.func @transform_4(%arg0: i32) -> (i32, i32) {
    %c0_i32 = arith.constant 0 : i32
    %c0_i32_0 = arith.constant 0 : i32
    %c0_i32_1 = arith.constant 0 : i32
    return %c0_i32, %c0_i32_0 : i32, i32
  }
  func.func @transform_5(%arg0: i32) -> (i32, i32) {
    %c0_i32 = arith.constant 0 : i32
    %c0_i32_0 = arith.constant 0 : i32
    %c0_i32_1 = arith.constant 0 : i32
    return %c0_i32, %c0_i32_0 : i32, i32
  }
  func.func @transform_6(%arg0: i32) -> (i32, i32) {
    %c0_i32 = arith.constant 0 : i32
    %c0_i32_0 = arith.constant 0 : i32
    %c0_i32_1 = arith.constant 0 : i32
    return %c0_i32, %c0_i32_0 : i32, i32
  }
  func.func @transform_7(%arg0: i32) -> (i32, i32) {
    %c0_i32 = arith.constant 0 : i32
    %c0_i32_0 = arith.constant 0 : i32
    %c0_i32_1 = arith.constant 0 : i32
    return %c0_i32, %c0_i32_0 : i32, i32
  }
  func.func @transform_8(%arg0: i32) -> (i32, i32) {
    %c0_i32 = arith.constant 0 : i32
    %c0_i32_0 = arith.constant 0 : i32
    %c0_i32_1 = arith.constant 0 : i32
    return %c0_i32, %c0_i32_0 : i32, i32
  }
  func.func @transform_9(%arg0: i32) -> (i32, i32, i32) {
    %c0_i32 = arith.constant 0 : i32
    %c0_i32_0 = arith.constant 0 : i32
    %c0_i32_1 = arith.constant 0 : i32
    return %arg0, %c0_i32, %c0_i32_0 : i32, i32, i32
  }
  func.func @transform_10(%arg0: i32) -> (i32, i32, i32) {
    %c0_i32 = arith.constant 0 : i32
    %c0_i32_0 = arith.constant 0 : i32
    %c0_i32_1 = arith.constant 0 : i32
    return %arg0, %c0_i32, %c0_i32_0 : i32, i32, i32
  }
}

</mosaic_0001>

<bundles_post_ra>
// kernel: tpu_custom_call.1
= control target key start
LH: loop header
LB: loop body
LE: loop exit
PB: predicated region body
PF: predicated region fallthrough
CT: control target
= control target key end

     0   :  { %s1449_s0 = inlined_call_operand.vmem [shape: f32[4,8,32], index: 0, kind: input, shape index: {}]   ;;  %s1450_s1 = inlined_call_operand.vmem [shape: f32[32,128], index: 1, kind: input, shape index: {}]   ;;  %s1451_s2 = inlined_call_operand.vmem [shape: f32[1,128], index: 2, kind: input, shape index: {}]   ;;  %s1452_s3 = inlined_call_operand.vmem [shape: f32[128,32], index: 3, kind: input, shape index: {}]   ;;  %s1453_s4 = inlined_call_operand.vmem [shape: f32[1,32], index: 4, kind: input, shape index: {}]   ;;  %s1454_s5 = inlined_call_operand.vmem [shape: f32[1,32], index: 5, kind: input, shape index: {}]   ;;  %s1455_s6 = inlined_call_operand.vmem [shape: f32[1,32], index: 6, kind: input, shape index: {}]   ;;  %s1456_s7 = inlined_call_operand.vmem [shape: f32[1,32], index: 7, kind: input, shape index: {}]   ;;  %s1457_s8 = inlined_call_operand.vmem [shape: f32[1,32], index: 8, kind: input, shape index: {}]   ;;  %s1458_s9 = inlined_call_operand.hbm [shape: f32[4,8,32], index: 9, kind: output, shape index: {0}]   ;;  %s1459_s10 = inlined_call_operand.hbm [shape: f32[4,8,8], index: 10, kind: output, shape index: {1}]  }
   0x1   :  { %1462 = sst [smem:[#allocation8_spill]] %s1449_s0 }
   0x2   :  { %1463 = sst [smem:[#allocation9_spill]] %s1450_s1 }
   0x3   :  { %1464 = sst [smem:[#allocation10_spill]] %s1451_s2 }
   0x4   :  { %16 = vsyncpa [#allocation3], 0 }
   0x5   :  { %18 = vsyncpa [#allocation3 + $0x1], 0 }
   0x6   :  { %19 = vsyncpa [#allocation5], 0 }
   0x7   :  { %21 = vsyncpa [#allocation5 + $0x1], 0  ;;  %s1204_s13 = smov 0   ;;  %s1206_s14 = smov 0  }
   0x8   :  { %s1208_s15 = smov 0   ;;  %s1210_s16 = smov 0  }
   0x9 LB: > { %s1225_s17 = sadd.s32 4294967295, %s1143_s16   ;;  %s894_s18 = sadd.s32 4294967294, %s1143_s16   ;;  %s1143_s16 = sphi %s1210_s16, %s1475_s16   ;;  %s1139_s15 = sphi %s1208_s15, %s1474_s15   ;;  %s1135_s14 = sphi %s1206_s14, %s1473_s14   ;;  %s1131_s13 = sphi %s1204_s13, %s1472_s13  }
   0xa   : > { %s1229_s19 = sadd.s32 1, %s1143_s16   ;;  %s228_s20 = sadd.s32 1, %s1139_s15 }
   0xb   : > { %s225_s21 = ssub.s32 %s1143_s16, %s1229_s19  ;;  %p238_p0 = scmp.ne.s32.totalorder %s1139_s15, %s1135_s14 }
   0xc   : > { %p226_p1 = scmp.eq.s32.totalorder %s225_s21, 0  ;;  %p239_p2 = scmp.eq.s32.totalorder %s1225_s17, 3 }
   0xd   : > { %p244_p3 = scmp.ne.s32.totalorder %s1135_s14, %s1131_s13  ;;  %p245_p4 = scmp.eq.s32.totalorder %s894_s18, 3 }
   0xe   : > { %s1240_s22 = scalar_select %p226_p1, %s1139_s15, %s228_s20  }
   0xf   : > { %p1242_p5 = por %p239_p2, %p238_p0  ;;  %p1246_p6 = por %p245_p4, %p244_p3 }
  0x10   : > { %p897_p7 = scmp.ge.s32.totalorder %s1143_s16, 1  ;;  %p320_p8 = scmp.lt.s32.totalorder %s1143_s16, 5 }
  0x12   : > { %p321_p9 = pnand %p897_p7, %p320_p8 }
  0x13   : > { %p362_p10 = scmp.lt.s32.totalorder (!%p321_p9), %s1225_s17, 3  ;;  %s1467_s0 = sld [smem:[#allocation8_spill]] (!%p321_p9) }
  0x14   : > { %324 = sbr.rel (%p321_p9) target bundleno = 1476 (0x5c4), region = 56  ;;  %s1272_s30 = sand.u32 (!%p321_p9), 1, %s1135_s14  }
  0x15   : > { %s1460_s11 = sshll.u32 (!%p321_p9), %s1272_s30, 3  ;;  %s1468_s1 = sld [smem:[#allocation9_spill]] (!%p321_p9) }
  0x16   : > { %s1278_s12 = scalar_lea.vmem (!%p321_p9), [#allocation4], %s1460_s11  ;;  %s1469_s2 = sld [smem:[#allocation10_spill]] (!%p321_p9) }
  0x17   : > { %s1461_s18 = sshll.u32 (!%p321_p9), %s1225_s17, 7  ;;  %s777_s27 = scalar_lea.sflag (!%p321_p9), [#allocation5], %s1272_s30 }
  0x19   : > { %v1145_v0 = vmov 0.0   ;;  %vm1146_vm0 = vmmov 0   ;;  %s363_s25 = scalar_select %p362_p10, %s1225_s17, 3  ;;  %vm367_vm1 = vcmask 261120   ;;  %vm442_vm2 = vcmask 64512   ;;  %v659_v23 = vld [vmem:[%s1452_s3 + $0x78] sm:$0xff] }
  0x1a   : > { %943 = vmatprep.subr.mxu1 %v1145_v0  ;;  %945 = vmatprep.mubr.msk.f32.mxu1 %vm1146_vm0, %v1145_v0  ;;  %v658_v24 = vld [vmem:[%s1452_s3 + $0x70] sm:$0xff]  ;;  %v657_v25 = vld [vmem:[%s1452_s3 + $0x68] sm:$0xff]  ;;  %v656_v26 = vld [vmem:[%s1452_s3 + $0x60] sm:$0xff] }
  0x1b   : > { %964 = vmatprep.subr.mxu0 %v1145_v0  ;;  %996 = vmatprep.mubr.msk.f32.mxu0 %vm1146_vm0, %v1145_v0  ;;  %s900_s26 = sshll.u32 %s363_s25, 3  ;;  %v562_v19 = vld [vmem:[%s1468_s1 + $0x18] sm:$0xff]  ;;  %v561_v20 = vld [vmem:[%s1468_s1 + $0x10] sm:$0xff]  ;;  %v560_v21 = vld [vmem:[%s1468_s1 + $0x8] sm:$0xff]  ;;  %s801_s25 = scalar_lea.hbm %s1459_s10, %s1461_s18 }
  0x1c   : > { %s365_s29 = scalar_lea.vmem %s1467_s0, %s900_s26  ;;  %v559_v22 = vld [vmem:[%s1468_s1] sm:$0xff]  ;;  %965 = vmatpush3.msra.mxu0 %v659_v23  ;;  %v655_v27 = vld [vmem:[%s1452_s3 + $0x58] sm:$0xff]  ;;  %v654_v28 = vld [vmem:[%s1452_s3 + $0x50] sm:$0xff]  ;;  %s803_s26 = sshll.u32 %s1278_s12, 4  ;;  %s804_s26 = int_to_ptr.vmem [resolvable:$true] %s803_s26 }
  0x1d   : > { %v366_v1 = vld [vmem:[%s365_s29] sm:$0xff]  ;;  %966 = vmatprep.subr.mxu0 %v1145_v0  ;;  %v653_v29 = vld [vmem:[%s1452_s3 + $0x48] sm:$0xff]  ;;  %v651_v31 = vld [vmem:[%s1452_s3 + $0x38] sm:$0xff]  ;;  %s1053_s28 = scalar_lea.vmem %s804_s26, 128  ;;  %s1147_s29 = smov [#allocation4]  }
  0x1e   : > { %944 = vmatpush3.xpose.msk.msra.mxu1 %vm367_vm1, %v366_v1  ;;  %967 = vmatpush3.msra.mxu0 %v658_v24  ;;  %v652_v30 = vld [vmem:[%s1452_s3 + $0x40] sm:$0xff]  ;;  %v650_v32 = vld [vmem:[%s1452_s3 + $0x30] sm:$0xff]  ;;  %v649_v33 = vld [vmem:[%s1452_s3 + $0x28] sm:$0xff]  ;;  %p1054_p11 = scmp.ne.s32.totalorder %s804_s26, %s1053_s28  ;;  %s1057_s11 = sshll.u32 %s1147_s29, 4  ;;  %s1058_s11 = int_to_ptr.vmem [resolvable:$false] %s1057_s11 }
  0x1f   : > { %948 = vmatprep.subr.mxu1 %v1145_v0  ;;  %968 = vmatprep.subr.mxu0 %v1145_v0  ;;  %v648_v34 = vld [vmem:[%s1452_s3 + $0x20] sm:$0xff]  ;;  %v647_v35 = vld [vmem:[%s1452_s3 + $0x18] sm:$0xff]  ;;  %v646_v50 = vld [vmem:[%s1452_s3 + $0x10] sm:$0xff]  ;;  %s1059_s0 = scalar_lea.vmem %s1058_s11, 256  ;;  %p1060_p0 = scmp.lt.s32.totalorder %s804_s26, %s1058_s11 }
  0x20   : > { %969 = vmatpush3.msra.mxu0 %v657_v25  ;;  %v904_v45 = vld [vmem:[%s1454_s5] ss:$0 sm:$0xff]  ;;  %v645_v51 = vld [vmem:[%s1452_s3 + $0x8] sm:$0xff]  ;;  %p1055_p12 = pnand %p1054_p11, %p1242_p5  ;;  %p1061_p1 = scmp.lt.s32.totalorder %s1059_s0, %s1053_s28 }
  0x21   : > { %946 = vmatmul.mubr.msk.f32.vlgmr.msra.gmra.mxu1 %vm367_vm1, %v366_v1  ;;  %970 = vmatprep.subr.mxu0 %v1145_v0  ;;  %v905_v47 = vld [vmem:[%s1455_s6] ss:$0 sm:$0xff] }
  0x22   : > { %949 = vmatpush3.msra.mxu1 %v366_v1  ;;  %950 = vmatprep.mubr.msk.f32.mxu1 %vm1146_vm0, %v1145_v0  ;;  %v644_v52 = vld [vmem:[%s1452_s3] sm:$0xff]  ;;  %p1056_p13 = pneg %p1055_p12  ;;  %p1062_p2 = por %p1061_p1, %p1060_p0 }
  0x23   : > { %953 = vmatprep.subr.mxu1 %v1145_v0  ;;  %971 = vmatpush3.msra.mxu0 %v656_v26  ;;  %v906_v53 = vld [vmem:[%s1469_s2] ss:$0 sm:$0xff] }
  0x24   : > { %972 = vmatprep.subr.mxu0 %v1145_v0  ;;  %v908_v58 = vld [vmem:[%s1453_s4] ss:$0 sm:$0xff]  ;;  %p1063_p3 = pnand %p1062_p2, %p1056_p13 }
  0x25   : > { %973 = vmatpush3.msra.mxu0 %v655_v27 }
  0x26   : > { %974 = vmatprep.subr.mxu0 %v1145_v0 }
  0x27   : > { %975 = vmatpush3.msra.mxu0 %v654_v28 }
  0x28   : > { %976 = vmatprep.subr.mxu0 %v1145_v0 }
  0x29   : > { %977 = vmatpush3.msra.mxu0 %v653_v29 }
  0x2a   : > { %978 = vmatprep.subr.mxu0 %v1145_v0 }
  0x2b   : > { %979 = vmatpush3.msra.mxu0 %v652_v30 }
  0x2c   : > { %980 = vmatprep.subr.mxu0 %v1145_v0 }
  0x2d   : > { %981 = vmatpush3.msra.mxu0 %v651_v31 }
  0x2e   : > { %982 = vmatprep.subr.mxu0 %v1145_v0 }
  0x2f   : > { %983 = vmatpush3.msra.mxu0 %v650_v32 }
  0x30   : > { %984 = vmatprep.subr.mxu0 %v1145_v0 }
  0x31   : > { %985 = vmatpush3.msra.mxu0 %v649_v33 }
  0x32   : > { %986 = vmatprep.subr.mxu0 %v1145_v0 }
  0x33   : > { %987 = vmatpush3.msra.mxu0 %v648_v34 }
  0x34   : > { %988 = vmatprep.subr.mxu0 %v1145_v0 }
  0x35   : > { %989 = vmatpush3.msra.mxu0 %v647_v35 }
  0x36   : > { %990 = vmatprep.subr.mxu0 %v1145_v0 }
  0x37   : > { %991 = vmatpush3.msra.mxu0 %v646_v50 }
  0x38   : > { %992 = vmatprep.subr.mxu0 %v1145_v0 }
  0x39   : > { %993 = vmatpush3.msra.mxu0 %v645_v51 }
  0x3a   : > { %994 = vmatprep.subr.mxu0 %v1145_v0 }
  0x3b   : > { %995 = vmatpush3.msra.mxu0 %v644_v52 }
  0xe1   : > { %v437_v2 = vpop.f32.mrf.mxu1 }
  0xe2   : > { %v441_v3 = vmul.f32 0.17677669, %v437_v2 }
  0xe3   : > { %v947_v4 = vpop.f32.mrf.mxu1 }
  0xe4   : > { %v443_v5 = vsel %vm442_vm2, %v441_v3, -inf }
  0xe5   : > { %444 = vmax.xlane.f32.xlu0 %v443_v5 }
 0x16e   : > { %v445_v6 = vpop.xlane.xlu0 %444 }
 0x16f   : > { %v446_v7 = vsub.f32 %v441_v3, %v445_v6 }
 0x171   : > { %v447_v8 = vmul.f32 1.442695, %v446_v7 }
 0x173   : > { %1045 = vpow2.f32 %v447_v8 }
 0x180   : > { %v1046_v9 = vpop.eup %1045 }
 0x181   : > { %v449_v10 = vsel %vm442_vm2, %v1046_v9, 0.0 }
 0x182   : > { %450 = vadd.xlane.f32.xlu0 %v449_v10 }
 0x20b   : > { %v451_v11 = vpop.xlane.xlu0 %450 }
 0x20c   : > { %1047 = vrcp.f32 %v451_v11 }
 0x219   : > { %v1048_v12 = vpop.eup %1047 }
 0x21a   : > { %v453_v13 = vmul.f32 %v1048_v12, %v1046_v9 }
 0x21c   : > { %951 = vmatmul.mubr.msk.f32.vlgmr.msra.gmra.mxu1 %vm442_vm2, %v453_v13  ;;  %770 = vst.msk [vmem:[%s1278_s12] sm:$0xff] %vm442_vm2, %v453_v13 }
 0x21d   : > { %961 = vmatprep.mubr.msk.f32.mxu1 %vm1146_vm0, %v1145_v0  ;;  %954 = vmatpush3.msra.mxu1 %v562_v19 }
 0x21e   : > { %955 = vmatprep.subr.mxu1 %v1145_v0 }
 0x21f   : > { %956 = vmatpush3.msra.mxu1 %v561_v20 }
 0x220   : > { %957 = vmatprep.subr.mxu1 %v1145_v0 }
 0x221   : > { %958 = vmatpush3.msra.mxu1 %v560_v21 }
 0x222   : > { %959 = vmatprep.subr.mxu1 %v1145_v0 }
 0x223   : > { %960 = vmatpush3.msra.mxu1 %v559_v22 }
 0x2dc   : > { %v1284_v14 = vpop.f32.mrf.mxu1 }
 0x2dd   : > { %v529_v15 = vsel %vm367_vm1, %v1284_v14, 0.0  ;;  %v534_v16 = vmul.f32 %v1284_v14, %v1284_v14 }
 0x2de   : > { %530 = vadd.xlane.f32.xlu1 %v529_v15  ;;  %v952_v17 = vpop.f32.mrf.mxu1 }
 0x2df   : > { %v535_v18 = vsel %vm367_vm1, %v534_v16, 0.0 }
 0x2e2   : > { %536 = vadd.xlane.f32.xlu1 %v535_v18 }
 0x367   : > { %v531_v36 = vpop.xlane.xlu1 %530 }
 0x368   : > { %v533_v37 = vmul.f32 0.03125, %v531_v36 }
 0x36a   : > { %v539_v39 = vmul.f32 %v533_v37, %v533_v37  ;;  %v541_v43 = vsub.f32 %v1284_v14, %v533_v37 }
 0x36b   : > { %v537_v38 = vpop.xlane.xlu1 %536 }
 0x36c   : > { %v538_v40 = vmul.f32 0.03125, %v537_v38 }
 0x36e   : > { %v540_v41 = vsub.f32 %v538_v40, %v539_v39 }
 0x370   : > { %v542_v42 = vadd.f32 1e-05, %v540_v41 }
 0x372   : > { %1049 = vrsqrt.f32 %v542_v42 }
 0x37f   : > { %v1050_v44 = vpop.eup %1049 }
 0x380   : > { %v544_v46 = vmul.f32 %v1050_v44, %v541_v43 }
 0x382   : > { %v551_v48 = vmul.f32 %v904_v45, %v544_v46 }
 0x384   : > { %v558_v49 = vadd.f32 %v905_v47, %v551_v48 }
 0x386   : > { %962 = vmatmul.mubr.msk.f32.vlgmr.msra.gmra.mxu1 %vm367_vm1, %v558_v49 }
 0x446   : > { %v639_v54 = vpop.f32.mrf.mxu1 }
 0x447   : > { %v640_v55 = vadd.f32 %v906_v53, %v639_v54 }
 0x448   : > { %v963_v56 = vpop.f32.mrf.mxu1 }
 0x449   : > { %v643_v57 = vmax.f32 %v640_v55, 0.0 }
 0x44b   : > { %997 = vmatmul.mubr.f32.vlgmr.msra.gmra.mxu0 %v643_v57 }
 0x50b   : > { %v733_v59 = vpop.f32.mrf.mxu0 }
 0x50c   : > { %v734_v60 = vadd.f32 %v908_v58, %v733_v59 }
 0x50d   : > { %v998_v61 = vpop.f32.mrf.mxu0 }
 0x50e   : > { %v737_v62 = vadd.f32 %v734_v60, %v558_v49 }
 0x510   : > { %v740_v63 = vsel %vm367_vm1, %v737_v62, 0.0  ;;  %v744_v0 = vmul.f32 %v737_v62, %v737_v62 }
 0x511   : > { %741 = vadd.xlane.f32.xlu0 %v740_v63 }
 0x512   : > { %v745_v1 = vsel %vm367_vm1, %v744_v0, 0.0 }
 0x513   : > { %746 = vadd.xlane.f32.xlu1 %v745_v1 }
 0x514   : > { %1066 = shalt.err (!%p1063_p3)
}
 0x515   : > { %s1067_s1 = scalar_lea.hbm %s801_s25, 128  ;;  %s1071_s21 = scalar_lea.hbm %s1459_s10, 512 }
 0x516   : > { %p1068_p4 = scmp.ne.s32.totalorder %s801_s25, %s1067_s1  ;;  %p1072_p9 = scmp.lt.s32.totalorder %s801_s25, %s1459_s10 }
 0x517   : > { %p1073_p10 = scmp.lt.s32.totalorder %s1071_s21, %s1067_s1 }
 0x518   : > { %p1069_p7 = pnand %p1068_p4, %p1242_p5 }
 0x519   : > { %p1074_p11 = por %p1073_p10, %p1072_p9 }
 0x51a   : > { %p1070_p8 = pneg %p1069_p7 }
 0x51c   : > { %p1075_p12 = pnand %p1074_p11, %p1070_p8 }
 0x51e   : > { %1078 = shalt.err (!%p1075_p12)
}
 0x51f   : > { %1000 = dma.vmem_to_hbm [thread:$0]  (%p1242_p5), %s804_s26, 128, %s801_s25, %s777_s27   ;;  %v909_v11 = vld [vmem:[%s1456_s7] ss:$0 sm:$0xff] }
 0x520   : > { %v910_v13 = vld [vmem:[%s1457_s8] ss:$0 sm:$0xff]  ;;  %s1470_s18 = sshll.u32 %s1272_s30, 3  ;;  %s1471_s27 = sshll.u32 %s1225_s17, 7 }
 0x521   : > { %s354_s25 = scalar_lea.vmem [#allocation2], %s1470_s18  ;;  %s788_s12 = scalar_lea.hbm %s1458_s9, %s1471_s27 }
 0x522   : > { %s790_s26 = sshll.u32 %s354_s25, 4  ;;  %s772_s20 = scalar_lea.sflag [#allocation3], %s1272_s30  ;;  %s791_s26 = int_to_ptr.vmem [resolvable:$true] %s790_s26 }
 0x523   : > { %s1079_s21 = scalar_lea.vmem %s791_s26, 128  ;;  %s1148_s0 = smov [#allocation2]  }
 0x524   : > { %p1080_p13 = scmp.ne.s32.totalorder %s791_s26, %s1079_s21  ;;  %s1083_s1 = sshll.u32 %s1148_s0, 4  ;;  %s1084_s1 = int_to_ptr.vmem [resolvable:$false] %s1083_s1 }
 0x525   : > { %s1085_s2 = scalar_lea.vmem %s1084_s1, 256  ;;  %p1086_p2 = scmp.lt.s32.totalorder %s791_s26, %s1084_s1 }
 0x526   : > { %p1081_p0 = pnand %p1080_p13, %p1242_p5  ;;  %p1087_p3 = scmp.lt.s32.totalorder %s1085_s2, %s1079_s21 }
 0x528   : > { %p1082_p1 = pneg %p1081_p0  ;;  %p1088_p4 = por %p1087_p3, %p1086_p2 }
 0x52a   : > { %p1089_p7 = pnand %p1088_p4, %p1082_p1 }
 0x59a   : > { %v742_v2 = vpop.xlane.xlu0 %741 }
 0x59b   : > { %v743_v3 = vmul.f32 0.03125, %v742_v2 }
 0x59c   : > { %v747_v4 = vpop.xlane.xlu1 %746 }
 0x59d   : > { %v749_v5 = vmul.f32 %v743_v3, %v743_v3  ;;  %v748_v6 = vmul.f32 0.03125, %v747_v4  ;;  %v751_v9 = vsub.f32 %v737_v62, %v743_v3 }
 0x59f   : > { %v750_v7 = vsub.f32 %v748_v6, %v749_v5 }
 0x5a1   : > { %v752_v8 = vadd.f32 1e-05, %v750_v7 }
 0x5a3   : > { %1051 = vrsqrt.f32 %v752_v8 }
 0x5b0   : > { %v1052_v10 = vpop.eup %1051 }
 0x5b1   : > { %v754_v12 = vmul.f32 %v1052_v10, %v751_v9 }
 0x5b3   : > { %v761_v14 = vmul.f32 %v909_v11, %v754_v12 }
 0x5b5   : > { %v768_v15 = vadd.f32 %v910_v13, %v761_v14 }
 0x5b7   : > { %769 = vst.msk [vmem:[%s354_s25] sm:$0xff] %vm367_vm1, %v768_v15 }
 0x5b8   : > { %1092 = shalt.err (!%p1089_p7)
}
 0x5b9   : > { %s1093_s17 = scalar_lea.hbm %s788_s12, 128  ;;  %s1097_s18 = scalar_lea.hbm %s1458_s9, 512 }
 0x5ba   : > { %p1094_p8 = scmp.ne.s32.totalorder %s788_s12, %s1093_s17  ;;  %p1098_p11 = scmp.lt.s32.totalorder %s788_s12, %s1458_s9 }
 0x5bb   : > { %p1099_p12 = scmp.lt.s32.totalorder %s1097_s18, %s1093_s17 }
 0x5bc   : > { %p1095_p9 = pnand %p1094_p8, %p1242_p5 }
 0x5bd   : > { %p1100_p13 = por %p1099_p12, %p1098_p11 }
 0x5be   : > { %p1096_p10 = pneg %p1095_p9 }
 0x5c0   : > { %p1101_p0 = pnand %p1100_p13, %p1096_p10 }
 0x5c2   : > { %1104 = shalt.err (!%p1101_p0)
}
 0x5c3   : > { %999 = dma.vmem_to_hbm [thread:$0]  (%p1242_p5), %s791_s26, 128, %s788_s12, %s772_s20  }
 0x5c4 PF: > { %p1010_p1 = scmp.ge.s32.totalorder %s1143_s16, 2  ;;  %s815_s28 = sand.u32 1, %s1131_s13  }
 0x5c5   : > { %s816_s29 = scalar_lea.sflag [#allocation3], %s815_s28 }
 0x5c6   : > { %p1004_p2 = pnand %p1010_p1, %p1246_p6 }
 0x5c8   : > { %p1005_p3 = pneg %p1004_p2 }
 0x5ca   : > { %1122 = dma.done.wait (%p1005_p3), %s816_s29, 128  }
 0x5cb   : > { %1124 = vsyncadd (%p1005_p3), %s816_s29, 4294967168  ;;  %s825_s21 = scalar_lea.sflag [#allocation5], %s815_s28 }
 0x5cc   : > { %1126 = dma.done.wait (%p1005_p3), %s825_s21, 128  }
 0x5cd   : > { %1128 = vsyncadd (%p1005_p3), %s825_s21, 4294967168  ;;  %p24_p5 = scmp.ge.s32.totalorder %s1229_s19, 6   ;;  %s1472_s13 = smov %s1135_s14 }
 0x5ce   : > { %s1473_s14 = smov %s1139_s15  ;;  %s1474_s15 = smov %s1240_s22 }
 0x5cf   : > { %s1475_s16 = smov %s1229_s19  ;;  %26 = sbr.rel (!%p24_p5) target bundleno = 9 (0x9), region = 108 }
 0x5d4   :  { %830 = vsyncpa [#allocation3], 1 }
 0x5d5   :  { %832 = vsyncpa [#allocation3 + $0x1], 1 }
 0x5d6   :  { %833 = vsyncpa [#allocation5], 1 }
 0x5d7   :  { %835 = vsyncpa [#allocation5 + $0x1], 1 }

</bundles_post_ra>
